<compile_context>
chip_gen: v6e
topology: v6e:2x2x1
jax: 0.10.0
libtpu: 0.0.40
codegen_flags: <defaults>
</compile_context>

<pallas_src>
import functools

import jax
import jax.numpy as jnp
from jax.experimental import pallas as pl
from jax.experimental.pallas import tpu as pltpu


_NEG_INF = -1e30   # baked into padded b2 lanes: they can never win the softmax
_LANE = 128        # TPU lane width (last-dim tiling granularity)


def _round_up(x, m):
    return ((x + m - 1) // m) * m


# ---------------------------------------------------------------------------
# One-time parameter prep (outside the hot path): pad hidden/out dims to the
# 128-lane grid, cast matmul operands to bf16, bake the lane mask into b2.
# ---------------------------------------------------------------------------
def prepare_actor_params(w1, b1, w2, b2, *, compute_dtype=jnp.bfloat16):
    d_in, hidden = w1.shape
    hidden_w, out_dim = w2.shape
    assert hidden == hidden_w
    h_pad = _round_up(hidden, _LANE)
    n_pad = _round_up(out_dim, _LANE)

    w1p = jnp.zeros((d_in, h_pad), compute_dtype).at[:, :hidden].set(
        w1.astype(compute_dtype))
    b1p = jnp.zeros((1, h_pad), jnp.float32).at[:, :hidden].set(
        b1.reshape(1, hidden).astype(jnp.float32))
    w2p = jnp.zeros((h_pad, n_pad), compute_dtype).at[:hidden, :out_dim].set(
        w2.astype(compute_dtype))
    # Padded output lanes get a huge negative bias; padded W2 columns are zero,
    # so padded logits come out exactly -1e30 and no in-kernel mask is needed.
    b2p = jnp.full((1, n_pad), _NEG_INF, jnp.float32).at[:, :out_dim].set(
        b2.reshape(1, out_dim).astype(jnp.float32))
    return {"w1": w1p, "b1": b1p, "w2": w2p, "b2": b2p, "out_dim": out_dim}


# ---------------------------------------------------------------------------
# Kernel. Grid = (batch tiles, hidden tiles). The output block (constant along
# the hidden axis) doubles as the fc2 f32 accumulator; log-softmax runs once
# on the last hidden step. When hidden fits resident, the second axis is 1.
# ---------------------------------------------------------------------------
def actor_kernel(x_ref, w1_ref, b1_ref, w2_ref, b2_ref, out_ref, *, compute_dtype):
    k = pl.program_id(1)

    @pl.when(k == 0)
    def _init():
        out_ref[...] = jnp.zeros_like(out_ref)

    # fc1 on the MXU (bf16 operands, f32 accumulation); bias + ReLU in f32.
    xb = x_ref[...].astype(compute_dtype)            # cast in-kernel (no wrapper pass)
    h = jnp.dot(xb, w1_ref[...], preferred_element_type=jnp.float32)
    h = jnp.maximum(h + b1_ref[...], 0.0)            # [TB, TH] f32

    # fc2 partial product accumulated into the VMEM-resident output block.
    out_ref[...] += jnp.dot(h.astype(compute_dtype), w2_ref[...],
                            preferred_element_type=jnp.float32)

    @pl.when(k == pl.num_programs(1) - 1)
    def _finalize():
        logits = out_ref[...] + b2_ref[...]          # padded lanes already -1e30
        m = jnp.max(logits, axis=-1, keepdims=True)
        shifted = logits - m
        lse = jnp.log(jnp.sum(jnp.exp(shifted), axis=-1, keepdims=True))
        out_ref[...] = (shifted - lse).astype(out_ref.dtype)   # lane-dense store


def _vmem_budget_bytes():
    cap = 64 << 20                          # conservative (v7x physical) if query fails
    try:
        cap = int(getattr(pltpu.get_tpu_info(), "vmem_capacity_bytes", cap))
    except Exception:
        pass
    return (3 * cap) // 4                   # ~48 MiB on v7x, ~96 MiB on v5e/v6e


def actor_forward(x, params, *, compute_dtype=jnp.bfloat16):
    """x: [B, D_in] f32; params: output of prepare_actor_params."""
    w1p, b1p, w2p, b2p = params["w1"], params["b1"], params["w2"], params["b2"]
    out_dim = params["out_dim"]
    batch, d_in = x.shape
    d_in_w, h_pad = w1p.shape
    h_pad_w, n_pad = w2p.shape
    assert d_in == d_in_w and h_pad == h_pad_w

    op_b = jnp.dtype(compute_dtype).itemsize
    budget = _vmem_budget_bytes()

    # ---- hidden tiling: keep weights resident if they fit, else K-tile them ----
    def weight_bytes(th, bufs):
        return bufs * ((d_in * th + th * n_pad) * op_b + th * 4) + n_pad * 4

    if weight_bytes(h_pad, 1) <= (6 * budget) // 10:
        tile_h, h_bufs = h_pad, 1                      # fully resident, single-buffered
    else:
        per_chunk = weight_bytes(_LANE, 2) - n_pad * 4  # per-128-lane, double-buffered
        tile_h = max(_LANE, ((budget // 2) // per_chunk) * _LANE)
        tile_h = min(tile_h, h_pad)
        while h_pad % tile_h:                          # chunks must tile h_pad exactly
            tile_h -= _LANE
        h_bufs = 2
    n_h = h_pad // tile_h

    # ---- batch tiling: biggest tile that honestly fits the VMEM budget ----
    resident = weight_bytes(tile_h, h_bufs)
    per_row = (2 * d_in * 4            # x tile (f32), double-buffered
               + 2 * n_pad * 4         # out tile (f32 accumulator), double-buffered
               + d_in * op_b           # in-kernel bf16 copy of x
               + tile_h * 4            # h (f32)
               + tile_h * op_b         # bf16 copy of h for the second matmul
               + 4 * n_pad * 4)        # logits / shifted / exp temporaries
    per_row = int(per_row * 1.15) + 64  # margin for Mosaic internal scratch

    fit_rows = max(8, ((budget - resident) // per_row) // 8 * 8)
    max_rows = min(fit_rows, _round_up(batch, 8))
    if max_rows >= 256:                 # full 256-wide MXU tiles (v6e/v7x)
        tile_b = (max_rows // 256) * 256
    elif max_rows >= 16:
        tile_b = (max_rows // 16) * 16
    else:
        tile_b = 8
    # Guarantee >= 2 batch grid steps so both v7x TensorCores get work.
    if batch >= 16 and pl.cdiv(batch, tile_b) == 1:
        tile_b = _round_up(pl.cdiv(batch, 2), 8)

    n_b = pl.cdiv(batch, tile_b)
    grid = (n_b, n_h)

    footprint = resident + tile_b * per_row
    vmem_limit = int(min(budget, max(footprint + (4 << 20), 16 << 20)))

    flops = 2 * batch * (d_in * h_pad + h_pad * n_pad)
    bytes_accessed = (x.size * 4 + w1p.size * op_b + b1p.size * 4
                      + w2p.size * op_b + b2p.size * 4 + batch * n_pad * 4)
    cost = pl.CostEstimate(flops=flops, transcendentals=batch * (n_pad + 1),
                           bytes_accessed=int(bytes_accessed))

    kernel = functools.partial(actor_kernel, compute_dtype=compute_dtype)
    have_buffered = hasattr(pl, "Buffered")

    def build(single_buffer_resident):
        def spec(shape, imap, is_resident):
            if single_buffer_resident and is_resident and have_buffered:
                return pl.BlockSpec(shape, imap, pipeline_mode=pl.Buffered(1))
            return pl.BlockSpec(shape, imap)

        res_w = (n_h == 1)   # weights only stay put when hidden is not K-tiled
        in_specs = [
            pl.BlockSpec((tile_b, d_in), lambda i, k: (i, 0)),   # x: streamed per tile
            spec((d_in, tile_h), lambda i, k: (0, k), res_w),    # W1
            spec((1, tile_h), lambda i, k: (0, k), res_w),       # b1
            spec((tile_h, n_pad), lambda i, k: (k, 0), res_w),   # W2
            spec((1, n_pad), lambda i, k: (0, 0), True),         # b2: always resident
        ]
        out_spec = pl.BlockSpec((tile_b, n_pad), lambda i, k: (i, 0))
        return pl.pallas_call(
            kernel,
            out_shape=jax.ShapeDtypeStruct((batch, n_pad), jnp.float32),
            grid=grid,
            in_specs=in_specs,
            out_specs=out_spec,
            compiler_params=pltpu.CompilerParams(
                dimension_semantics=("parallel", "arbitrary"),   # megacore on batch
                vmem_limit_bytes=vmem_limit),
            cost_estimate=cost,
        )

    try:
        out_padded = build(True)(x, w1p, b1p, w2p, b2p)
    except Exception:
        # Fallback: default double-buffering everywhere (if Buffered(1) rejects).
        out_padded = build(False)(x, w1p, b1p, w2p, b2p)

    # Drop the lane-padded columns (batch was never padded).
    return out_padded[:, :out_dim]


def init_actor_params(key, input_dim, hidden, out_dim):
    """Deterministic init mimicking PyTorch nn.Linear default (uniform +/- 1/sqrt(fan_in))."""
    k1, k2, k3, k4 = jax.random.split(key, 4)
    bound1 = 1.0 / (input_dim ** 0.5)
    bound2 = 1.0 / (hidden ** 0.5)
    # stored as [in, out] so the kernel computes x @ W
    w1 = jax.random.uniform(k1, (input_dim, hidden), jnp.float32, -bound1, bound1)
    b1 = jax.random.uniform(k2, (1, hidden), jnp.float32, -bound1, bound1)
    w2 = jax.random.uniform(k3, (hidden, out_dim), jnp.float32, -bound2, bound2)
    b2 = jax.random.uniform(k4, (1, out_dim), jnp.float32, -bound2, bound2)
    return w1, b1, w2, b2


if __name__ == "__main__":
    batch, input_dim, hidden, out_dim = 16, 16, 32, 8

    key = jax.random.PRNGKey(0)
    kx, kp = jax.random.split(key)
    x = jax.random.normal(kx, (batch, input_dim), jnp.float32)
    w1, b1, w2, b2 = init_actor_params(kp, input_dim, hidden, out_dim)

    params = prepare_actor_params(w1, b1, w2, b2)   # one-time prep, off the hot path
    out = actor_forward(x, params)                  # batch=16 -> 2-step streamed grid
    jax.block_until_ready(out)

    # Reference with the same bf16 matmul operands / f32 accumulation.
    xb, w1b, w2b = (a.astype(jnp.bfloat16) for a in (x, w1, w2))
    h_ref = jnp.maximum(jnp.dot(xb, w1b, preferred_element_type=jnp.float32) + b1, 0.0)
    logits_ref = jnp.dot(h_ref.astype(jnp.bfloat16), w2b,
                         preferred_element_type=jnp.float32) + b2
    ref = jax.nn.log_softmax(logits_ref, axis=-1)

    assert out.shape == (batch, out_dim)
    assert jnp.allclose(out, ref, atol=1e-4, rtol=1e-4), "mismatch vs reference"

    print("KERNEL_OK")
</pallas_src>

<mosaic_0001>
module attributes {stable_mosaic.version = 11 : i64} {
  func.func @actor_kernel(%arg0: i32, %arg1: i32, %arg2: memref<8x16xf32, #tpu.memory_space<vmem>>, %arg3: memref<16x128xbf16, #tpu.memory_space<vmem>>, %arg4: memref<1x128xf32, #tpu.memory_space<vmem>>, %arg5: memref<128x128xbf16, #tpu.memory_space<vmem>>, %arg6: memref<1x128xf32, #tpu.memory_space<vmem>>, %arg7: memref<8x128xf32, #tpu.memory_space<vmem>>) attributes {dimension_semantics = [#tpu.dimension_semantics<parallel>, #tpu.dimension_semantics<arbitrary>], iteration_bounds = array<i64: 2, 1>, scalar_prefetch = 0 : i64, scratch_operands = 0 : i64, tpu.core_type = #tpu.core_type<tc>, window_params = [{transform_indices = @transform_0, window_bounds = array<i64: 8, 16>}, {pipeline_mode = #tpu.pipeline_mode<synchronous>, transform_indices = @transform_1, window_bounds = array<i64: 16, 128>}, {pipeline_mode = #tpu.pipeline_mode<synchronous>, transform_indices = @transform_2, window_bounds = array<i64: 1, 128>}, {pipeline_mode = #tpu.pipeline_mode<synchronous>, transform_indices = @transform_3, window_bounds = array<i64: 128, 128>}, {pipeline_mode = #tpu.pipeline_mode<synchronous>, transform_indices = @transform_4, window_bounds = array<i64: 1, 128>}, {transform_indices = @transform_5, window_bounds = array<i64: 8, 128>}]} {
    %c0_i32 = arith.constant 0 : i32
    %0 = arith.cmpi eq, %arg1, %c0_i32 : i32
    %1 = arith.extui %0 : i1 to i32
    %c0_i32_0 = arith.constant 0 : i32
    %2 = arith.cmpi ne, %1, %c0_i32_0 : i32
    scf.if %2 {
      %cst_16 = arith.constant 0.000000e+00 : f32
      %21 = vector.broadcast %cst_16 : f32 to vector<8x128xf32>
      %c0_17 = arith.constant 0 : index
      %c0_18 = arith.constant 0 : index
      %22 = vector.load %arg7[%c0_17, %c0_18] : memref<8x128xf32, #tpu.memory_space<vmem>>, vector<8x128xf32>
      tpu.vector_store %arg7[%c0_17, %c0_18], %21 {strides = array<i32>} : memref<8x128xf32, #tpu.memory_space<vmem>>, vector<8x128xf32>,
    } else {
    }
    %c0 = arith.constant 0 : index
    %c0_1 = arith.constant 0 : index
    %3 = vector.load %arg2[%c0, %c0_1] : memref<8x16xf32, #tpu.memory_space<vmem>>, vector<8x16xf32>
    %4 = arith.truncf %3 : vector<8x16xf32> to vector<8x16xbf16>
    %c0_2 = arith.constant 0 : index
    %c0_3 = arith.constant 0 : index
    %5 = vector.load %arg3[%c0_2, %c0_3] : memref<16x128xbf16, #tpu.memory_space<vmem>>, vector<16x128xbf16>
    %cst = arith.constant dense<0.000000e+00> : vector<8x128xf32>
    %6 = tpu.matmul %4, %5, %cst {dimension_numbers = #tpu.dot_dimension_numbers<[1], [0], [0], [1], [0, 0, 1, 1], [], []>} : vector<8x16xbf16>, vector<16x128xbf16>, vector<8x128xf32> -> vector<8x128xf32>
    %c0_4 = arith.constant 0 : index
    %c0_5 = arith.constant 0 : index
    %7 = vector.load %arg4[%c0_4, %c0_5] : memref<1x128xf32, #tpu.memory_space<vmem>>, vector<1x128xf32>
    %8 = vector.broadcast %7 : vector<1x128xf32> to vector<8x128xf32>
    %9 = arith.addf %6, %8 : vector<8x128xf32>
    %cst_6 = arith.constant 0.000000e+00 : f32
    %10 = vector.broadcast %cst_6 : f32 to vector<8x128xf32>
    %11 = arith.maximumf %9, %10 : vector<8x128xf32>
    %c0_7 = arith.constant 0 : index
    %c0_8 = arith.constant 0 : index
    %12 = vector.load %arg7[%c0_7, %c0_8] : memref<8x128xf32, #tpu.memory_space<vmem>>, vector<8x128xf32>
    %13 = arith.truncf %11 : vector<8x128xf32> to vector<8x128xbf16>
    %c0_9 = arith.constant 0 : index
    %c0_10 = arith.constant 0 : index
    %14 = vector.load %arg5[%c0_9, %c0_10] : memref<128x128xbf16, #tpu.memory_space<vmem>>, vector<128x128xbf16>
    %cst_11 = arith.constant dense<0.000000e+00> : vector<8x128xf32>
    %15 = tpu.matmul %13, %14, %cst_11 {dimension_numbers = #tpu.dot_dimension_numbers<[1], [0], [0], [1], [0, 0, 1, 1], [], []>} : vector<8x128xbf16>, vector<128x128xbf16>, vector<8x128xf32> -> vector<8x128xf32>
    %16 = arith.addf %12, %15 : vector<8x128xf32>
    %c0_12 = arith.constant 0 : index
    %c0_13 = arith.constant 0 : index
    %17 = vector.load %arg7[%c0_12, %c0_13] : memref<8x128xf32, #tpu.memory_space<vmem>>, vector<8x128xf32>
    tpu.vector_store %arg7[%c0_12, %c0_13], %16 {strides = array<i32>} : memref<8x128xf32, #tpu.memory_space<vmem>>, vector<8x128xf32>,
    %c0_i32_14 = arith.constant 0 : i32
    %18 = arith.cmpi eq, %arg1, %c0_i32_14 : i32
    %19 = arith.extui %18 : i1 to i32
    %c0_i32_15 = arith.constant 0 : i32
    %20 = arith.cmpi ne, %19, %c0_i32_15 : i32
    scf.if %20 {
      %c0_16 = arith.constant 0 : index
      %c0_17 = arith.constant 0 : index
      %21 = vector.load %arg7[%c0_16, %c0_17] : memref<8x128xf32, #tpu.memory_space<vmem>>, vector<8x128xf32>
      %c0_18 = arith.constant 0 : index
      %c0_19 = arith.constant 0 : index
      %22 = vector.load %arg6[%c0_18, %c0_19] : memref<1x128xf32, #tpu.memory_space<vmem>>, vector<1x128xf32>
      %23 = vector.broadcast %22 : vector<1x128xf32> to vector<8x128xf32>
      %24 = arith.addf %21, %23 : vector<8x128xf32>
      %cst_20 = arith.constant dense<0xFF800000> : vector<8xf32>
      %25 = vector.multi_reduction <maximumf>, %24, %cst_20 [1] : vector<8x128xf32> to vector<8xf32>
      %26 = vector.shape_cast %25 : vector<8xf32> to vector<8x1xf32>
      %27 = vector.broadcast %26 : vector<8x1xf32> to vector<8x128xf32>
      %28 = arith.subf %24, %27 : vector<8x128xf32>
      %29 = math.exp %28 : vector<8x128xf32>
      %cst_21 = arith.constant dense<0.000000e+00> : vector<8xf32>
      %30 = vector.multi_reduction <add>, %29, %cst_21 [1] : vector<8x128xf32> to vector<8xf32>
      %31 = vector.shape_cast %30 : vector<8xf32> to vector<8x1xf32>
      %32 = math.log %31 : vector<8x1xf32>
      %33 = vector.broadcast %32 : vector<8x1xf32> to vector<8x128xf32>
      %34 = arith.subf %28, %33 : vector<8x128xf32>
      %c0_22 = arith.constant 0 : index
      %c0_23 = arith.constant 0 : index
      %35 = vector.load %arg7[%c0_22, %c0_23] : memref<8x128xf32, #tpu.memory_space<vmem>>, vector<8x128xf32>
      tpu.vector_store %arg7[%c0_22, %c0_23], %34 {strides = array<i32>} : memref<8x128xf32, #tpu.memory_space<vmem>>, vector<8x128xf32>,
    } else {
    }
    return
  }
  func.func @transform_0(%arg0: i32, %arg1: i32) -> (i32, i32) {
    %c0_i32 = arith.constant 0 : i32
    %c0_i32_0 = arith.constant 0 : i32
    return %arg0, %c0_i32 : i32, i32
  }
  func.func @transform_1(%arg0: i32, %arg1: i32) -> (i32, i32) {
    %c0_i32 = arith.constant 0 : i32
    %c0_i32_0 = arith.constant 0 : i32
    return %c0_i32, %arg1 : i32, i32
  }
  func.func @transform_2(%arg0: i32, %arg1: i32) -> (i32, i32) {
    %c0_i32 = arith.constant 0 : i32
    %c0_i32_0 = arith.constant 0 : i32
    return %c0_i32, %arg1 : i32, i32
  }
  func.func @transform_3(%arg0: i32, %arg1: i32) -> (i32, i32) {
    %c0_i32 = arith.constant 0 : i32
    %c0_i32_0 = arith.constant 0 : i32
    return %arg1, %c0_i32 : i32, i32
  }
  func.func @transform_4(%arg0: i32, %arg1: i32) -> (i32, i32) {
    %c0_i32 = arith.constant 0 : i32
    %c0_i32_0 = arith.constant 0 : i32
    %c0_i32_1 = arith.constant 0 : i32
    return %c0_i32, %c0_i32_0 : i32, i32
  }
  func.func @transform_5(%arg0: i32, %arg1: i32) -> (i32, i32) {
    %c0_i32 = arith.constant 0 : i32
    %c0_i32_0 = arith.constant 0 : i32
    return %arg0, %c0_i32 : i32, i32
  }
}

module attributes {stable_mosaic.version = 11 : i64} {
  func.func @actor_kernel(%arg0: i32, %arg1: i32, %arg2: memref<8x16xf32, #tpu.memory_space<vmem>>, %arg3: memref<16x128xbf16, #tpu.memory_space<vmem>>, %arg4: memref<1x128xf32, #tpu.memory_space<vmem>>, %arg5: memref<128x128xbf16, #tpu.memory_space<vmem>>, %arg6: memref<1x128xf32, #tpu.memory_space<vmem>>, %arg7: memref<8x128xf32, #tpu.memory_space<vmem>>) attributes {dimension_semantics = [#tpu.dimension_semantics<parallel>, #tpu.dimension_semantics<arbitrary>], iteration_bounds = array<i64: 2, 1>, scalar_prefetch = 0 : i64, scratch_operands = 0 : i64, tpu.core_type = #tpu.core_type<tc>, window_params = [{transform_indices = @transform_0, window_bounds = array<i64: 8, 16>}, {transform_indices = @transform_1, window_bounds = array<i64: 16, 128>}, {transform_indices = @transform_2, window_bounds = array<i64: 1, 128>}, {transform_indices = @transform_3, window_bounds = array<i64: 128, 128>}, {pipeline_mode = #tpu.pipeline_mode<synchronous>, transform_indices = @transform_4, window_bounds = array<i64: 1, 128>}, {transform_indices = @transform_5, window_bounds = array<i64: 8, 128>}]} {
    %c0_i32 = arith.constant 0 : i32
    %0 = arith.cmpi eq, %arg1, %c0_i32 : i32
    %1 = arith.extui %0 : i1 to i32
    %c0_i32_0 = arith.constant 0 : i32
    %2 = arith.cmpi ne, %1, %c0_i32_0 : i32
    scf.if %2 {
      %cst_16 = arith.constant 0.000000e+00 : f32
      %21 = vector.broadcast %cst_16 : f32 to vector<8x128xf32>
      %c0_17 = arith.constant 0 : index
      %c0_18 = arith.constant 0 : index
      %22 = vector.load %arg7[%c0_17, %c0_18] : memref<8x128xf32, #tpu.memory_space<vmem>>, vector<8x128xf32>
      tpu.vector_store %arg7[%c0_17, %c0_18], %21 {strides = array<i32>} : memref<8x128xf32, #tpu.memory_space<vmem>>, vector<8x128xf32>,
    } else {
    }
    %c0 = arith.constant 0 : index
    %c0_1 = arith.constant 0 : index
    %3 = vector.load %arg2[%c0, %c0_1] : memref<8x16xf32, #tpu.memory_space<vmem>>, vector<8x16xf32>
    %4 = arith.truncf %3 : vector<8x16xf32> to vector<8x16xbf16>
    %c0_2 = arith.constant 0 : index
    %c0_3 = arith.constant 0 : index
    %5 = vector.load %arg3[%c0_2, %c0_3] : memref<16x128xbf16, #tpu.memory_space<vmem>>, vector<16x128xbf16>
    %cst = arith.constant dense<0.000000e+00> : vector<8x128xf32>
    %6 = tpu.matmul %4, %5, %cst {dimension_numbers = #tpu.dot_dimension_numbers<[1], [0], [0], [1], [0, 0, 1, 1], [], []>} : vector<8x16xbf16>, vector<16x128xbf16>, vector<8x128xf32> -> vector<8x128xf32>
    %c0_4 = arith.constant 0 : index
    %c0_5 = arith.constant 0 : index
    %7 = vector.load %arg4[%c0_4, %c0_5] : memref<1x128xf32, #tpu.memory_space<vmem>>, vector<1x128xf32>
    %8 = vector.broadcast %7 : vector<1x128xf32> to vector<8x128xf32>
    %9 = arith.addf %6, %8 : vector<8x128xf32>
    %cst_6 = arith.constant 0.000000e+00 : f32
    %10 = vector.broadcast %cst_6 : f32 to vector<8x128xf32>
    %11 = arith.maximumf %9, %10 : vector<8x128xf32>
    %c0_7 = arith.constant 0 : index
    %c0_8 = arith.constant 0 : index
    %12 = vector.load %arg7[%c0_7, %c0_8] : memref<8x128xf32, #tpu.memory_space<vmem>>, vector<8x128xf32>
    %13 = arith.truncf %11 : vector<8x128xf32> to vector<8x128xbf16>
    %c0_9 = arith.constant 0 : index
    %c0_10 = arith.constant 0 : index
    %14 = vector.load %arg5[%c0_9, %c0_10] : memref<128x128xbf16, #tpu.memory_space<vmem>>, vector<128x128xbf16>
    %cst_11 = arith.constant dense<0.000000e+00> : vector<8x128xf32>
    %15 = tpu.matmul %13, %14, %cst_11 {dimension_numbers = #tpu.dot_dimension_numbers<[1], [0], [0], [1], [0, 0, 1, 1], [], []>} : vector<8x128xbf16>, vector<128x128xbf16>, vector<8x128xf32> -> vector<8x128xf32>
    %16 = arith.addf %12, %15 : vector<8x128xf32>
    %c0_12 = arith.constant 0 : index
    %c0_13 = arith.constant 0 : index
    %17 = vector.load %arg7[%c0_12, %c0_13] : memref<8x128xf32, #tpu.memory_space<vmem>>, vector<8x128xf32>
    tpu.vector_store %arg7[%c0_12, %c0_13], %16 {strides = array<i32>} : memref<8x128xf32, #tpu.memory_space<vmem>>, vector<8x128xf32>,
    %c0_i32_14 = arith.constant 0 : i32
    %18 = arith.cmpi eq, %arg1, %c0_i32_14 : i32
    %19 = arith.extui %18 : i1 to i32
    %c0_i32_15 = arith.constant 0 : i32
    %20 = arith.cmpi ne, %19, %c0_i32_15 : i32
    scf.if %20 {
      %c0_16 = arith.constant 0 : index
      %c0_17 = arith.constant 0 : index
      %21 = vector.load %arg7[%c0_16, %c0_17] : memref<8x128xf32, #tpu.memory_space<vmem>>, vector<8x128xf32>
      %c0_18 = arith.constant 0 : index
      %c0_19 = arith.constant 0 : index
      %22 = vector.load %arg6[%c0_18, %c0_19] : memref<1x128xf32, #tpu.memory_space<vmem>>, vector<1x128xf32>
      %23 = vector.broadcast %22 : vector<1x128xf32> to vector<8x128xf32>
      %24 = arith.addf %21, %23 : vector<8x128xf32>
      %cst_20 = arith.constant dense<0xFF800000> : vector<8xf32>
      %25 = vector.multi_reduction <maximumf>, %24, %cst_20 [1] : vector<8x128xf32> to vector<8xf32>
      %26 = vector.shape_cast %25 : vector<8xf32> to vector<8x1xf32>
      %27 = vector.broadcast %26 : vector<8x1xf32> to vector<8x128xf32>
      %28 = arith.subf %24, %27 : vector<8x128xf32>
      %29 = math.exp %28 : vector<8x128xf32>
      %cst_21 = arith.constant dense<0.000000e+00> : vector<8xf32>
      %30 = vector.multi_reduction <add>, %29, %cst_21 [1] : vector<8x128xf32> to vector<8xf32>
      %31 = vector.shape_cast %30 : vector<8xf32> to vector<8x1xf32>
      %32 = math.log %31 : vector<8x1xf32>
      %33 = vector.broadcast %32 : vector<8x1xf32> to vector<8x128xf32>
      %34 = arith.subf %28, %33 : vector<8x128xf32>
      %c0_22 = arith.constant 0 : index
      %c0_23 = arith.constant 0 : index
      %35 = vector.load %arg7[%c0_22, %c0_23] : memref<8x128xf32, #tpu.memory_space<vmem>>, vector<8x128xf32>
      tpu.vector_store %arg7[%c0_22, %c0_23], %34 {strides = array<i32>} : memref<8x128xf32, #tpu.memory_space<vmem>>, vector<8x128xf32>,
    } else {
    }
    return
  }
  func.func @transform_0(%arg0: i32, %arg1: i32) -> (i32, i32) {
    %c0_i32 = arith.constant 0 : i32
    %c0_i32_0 = arith.constant 0 : i32
    return %arg0, %c0_i32 : i32, i32
  }
  func.func @transform_1(%arg0: i32, %arg1: i32) -> (i32, i32) {
    %c0_i32 = arith.constant 0 : i32
    %c0_i32_0 = arith.constant 0 : i32
    return %c0_i32, %arg1 : i32, i32
  }
  func.func @transform_2(%arg0: i32, %arg1: i32) -> (i32, i32) {
    %c0_i32 = arith.constant 0 : i32
    %c0_i32_0 = arith.constant 0 : i32
    return %c0_i32, %arg1 : i32, i32
  }
  func.func @transform_3(%arg0: i32, %arg1: i32) -> (i32, i32) {
    %c0_i32 = arith.constant 0 : i32
    %c0_i32_0 = arith.constant 0 : i32
    return %arg1, %c0_i32 : i32, i32
  }
  func.func @transform_4(%arg0: i32, %arg1: i32) -> (i32, i32) {
    %c0_i32 = arith.constant 0 : i32
    %c0_i32_0 = arith.constant 0 : i32
    %c0_i32_1 = arith.constant 0 : i32
    return %c0_i32, %c0_i32_0 : i32, i32
  }
  func.func @transform_5(%arg0: i32, %arg1: i32) -> (i32, i32) {
    %c0_i32 = arith.constant 0 : i32
    %c0_i32_0 = arith.constant 0 : i32
    return %arg0, %c0_i32 : i32, i32
  }
}

</mosaic_0001>

<bundles_post_ra>
// kernel: tpu_custom_call.1
= control target key start
LH: loop header
LB: loop body
LE: loop exit
PB: predicated region body
PF: predicated region fallthrough
CT: control target
= control target key end

     0   :  { %s1192_s0 = inlined_call_operand.hbm [shape: f32[16,16], index: 0, kind: input, shape index: {}]   ;;  %s1193_s1 = inlined_call_operand.hbm [shape: bf16[16,128], index: 1, kind: input, shape index: {}]   ;;  %s1194_s2 = inlined_call_operand.vmem [shape: f32[1,128], index: 2, kind: input, shape index: {}]   ;;  %s1195_s3 = inlined_call_operand.hbm [shape: bf16[128,128], index: 3, kind: input, shape index: {}]   ;;  %s1196_s4 = inlined_call_operand.vmem [shape: f32[1,128], index: 4, kind: input, shape index: {}]   ;;  %s1197_s5 = inlined_call_operand.hbm [shape: f32[16,128], index: 5, kind: output, shape index: {}]  }
   0x1   :  { %1201 = sst [smem:[#allocation12_spill]] %s1193_s1 }
   0x2   :  { %10 = vsyncpa [#allocation3], 0 }
   0x3   :  { %12 = vsyncpa [#allocation3 + $0x1], 0 }
   0x4   :  { %13 = vsyncpa [#allocation6], 0 }
   0x5   :  { %14 = vsyncpa [#allocation4], 0 }
   0x6   :  { %16 = vsyncpa [#allocation4 + $0x1], 0  ;;  %s1008_s18 = smov 0   ;;  %s1010_s19 = smov 0  }
   0x7   :  { %s1012_s20 = smov 0   ;;  %s1014_s21 = smov 0  }
   0x8   :  { %s1016_s22 = smov 0   ;;  %s1018_s23 = smov 0  }
   0x9 LB: > { %s637_s24 = sadd.s32 4294967295, %s968_s23   ;;  %s638_s25 = sadd.s32 4294967294, %s968_s23   ;;  %s968_s23 = sphi %s1018_s23, %s22_s23   ;;  %s964_s22 = sphi %s1016_s22, %s1219_s22   ;;  %s960_s21 = sphi %s1014_s21, %s1218_s21   ;;  %s956_s20 = sphi %s1012_s20, %s1217_s20   ;;  %s952_s19 = sphi %s1010_s19, %s1216_s19   ;;  %s948_s18 = sphi %s1008_s18, %s1215_s18  }
   0xa   : > { %p54_p0 = scmp.ne.s32.totalorder %s952_s19, %s948_s18  ;;  %p1042_p1 = scmp.eq.s32.totalorder %s637_s24, 0 }
   0xb   : > { %p1046_p2 = scmp.eq.s32.totalorder %s637_s24, 1  ;;  %p183_p3 = scmp.eq.s32.totalorder %s638_s25, 1 }
   0xc   : > { %s1202_s26 = scalar_select %p1042_p1, 1, 0 }
   0xd   : > { %p1052_p4 = por %p1042_p1, %p54_p0  ;;  %p639_p5 = scmp.ge.s32.totalorder %s968_s23, 1 }
   0xe   : > { %p1057_p6 = por %p183_p3, %p54_p0  ;;  %p190_p7 = scmp.lt.s32.totalorder %s968_s23, 3 }
   0xf   : > { %s1204_s28 = scalar_select %p1052_p4, 1, 0 }
  0x10   : > { %s1205_s29 = scalar_select %p1057_p6, 1, 0 }
  0x11   : > { %p1062_p8 = pnand %p639_p5, %p190_p7  ;;  %s970_s6 = smov [#allocation5]  }
  0x12   : > { %s204_s7 = sshll.u32 %s970_s6, 4  ;;  %s971_s9 = smov [#allocation7]   ;;  %s205_s7 = int_to_ptr.vmem [resolvable:$true] %s204_s7 }
  0x13   : > { %p716_p9 = pneg %p1062_p8  ;;  %s226_s10 = sshll.u32 %s971_s9, 4  ;;  %s227_s10 = int_to_ptr.vmem [resolvable:$true] %s226_s10 }
  0x14   : > { %s815_s11 = scalar_lea.vmem %s205_s7, 128  ;;  %p823_p5 = scmp.lt.s32.totalorder %s205_s7, %s205_s7 }
  0x15   : > { %p1071_p11 = pnand %p716_p9, %p1042_p1  ;;  %p816_p13 = scmp.ne.s32.totalorder %s205_s7, %s815_s11 }
  0x16   : > { %p824_p7 = scmp.lt.s32.totalorder %s815_s11, %s815_s11 }
  0x17   : > { %p806_p12 = pneg %p1071_p11 }
  0x18   : > { %p825_p10 = por %p824_p7, %p823_p5 }
  0x19   : > { %p818_p0 = pnand %p816_p13, %p806_p12 }
  0x1b   : > { %p819_p3 = pneg %p818_p0 }
  0x1d   : > { %p826_p9 = pnand %p825_p10, %p819_p3 }
  0x1f   : > { %829 = shalt.err (!%p826_p9)
}
  0x20   : > { %s972_s12 = smov 64   ;;  %s973_s13 = smov 4  }
  0x21   : > { %s1208_s1 = sld [smem:[#allocation12_spill]]  ;;  %s841_s16 = scalar_lea.vmem %s227_s10, 1024 }
  0x22   : > { %p842_p6 = scmp.ne.s32.totalorder %s227_s10, %s841_s16  ;;  %p849_p1 = scmp.lt.s32.totalorder %s227_s10, %s227_s10 }
  0x23   : > { %p850_p4 = scmp.lt.s32.totalorder %s841_s16, %s841_s16 }
  0x24   : > { %p844_p13 = pnand %p842_p6, %p806_p12 }
  0x25   : > { %p851_p5 = por %p850_p4, %p849_p1 }
  0x26   : > { %p845_p0 = pneg %p844_p13 }
  0x27   : > { %719 = dma.hbm_to_vmem [thread:$0]  (!%p1071_p11), %s1208_s1, 128, %s205_s7, [#allocation6], %s972_s12, %s972_s12, %s973_s13  }
  0x28   : > { %p852_p10 = pnand %p851_p5, %p845_p0 }
  0x2a   : > { %855 = shalt.err (!%p852_p10)
}
  0x2b   : > { %722 = dma.hbm_to_vmem [thread:$0]  (!%p1071_p11), %s1195_s3, 1024, %s227_s10, [#allocation6], %s972_s12, %s972_s12, %s973_s13  }
  0x2c   : > { %s34_s25 = sadd.s32 1, %s964_s22  ;;  %s41_s6 = sadd.s32 1, %s956_s20 }
  0x2d   : > { %p36_p1 = scmp.ge.s32.totalorder %s34_s25, 2  ;;  %p48_p4 = scmp.ne.s32.totalorder %s956_s20, %s952_s19 }
  0x2e   : > { %p49_p6 = scmp.eq.s32.totalorder %s968_s23, 0  ;;  %p733_p12 = scmp.lt.s32.totalorder %s968_s23, 2 }
  0x2f   : > { %s1221_s25 = smov (%p36_p1, %s34_s25), 0  ;;  %p1103_p7 = por %p1046_p2, %p48_p4 }
  0x30   : > { %p50_p3 = por %p49_p6, %p48_p4  ;;  %s38_s8 = ssub.s32 %s964_s22, %s1221_s25 }
  0x31   : > { %s243_s9 = sand.u32 1, %s956_s20   ;;  %p39_p9 = scmp.eq.s32.totalorder %s38_s8, 0 }
  0x32   : > { %s644_s10 = sshll.u32 %s243_s9, 3  ;;  %s645_s11 = sshll.u32 %s964_s22, 7 }
  0x33   : > { %s1112_s12 = scalar_select %p39_p9, %s956_s20, %s41_s6  }
  0x34   : > { %s252_s15 = scalar_lea.hbm %s1192_s0, %s645_s11  ;;  %s247_s16 = scalar_lea.vmem [#allocation2], %s644_s10 }
  0x35   : > { %s254_s17 = sshll.u32 %s247_s16, 4  ;;  %p1119_p11 = pnand %p733_p12, %p50_p3  ;;  %s255_s17 = int_to_ptr.vmem [resolvable:$true] %s254_s17 }
  0x36   : > { %s244_s24 = scalar_lea.sflag [#allocation3], %s243_s9  ;;  %s869_s8 = scalar_lea.vmem %s255_s17, 128 }
  0x37   : > { %p858_p2 = pneg %p1119_p11  ;;  %p870_p13 = scmp.ne.s32.totalorder %s255_s17, %s869_s8 }
  0x38   : > { %s974_s6 = smov [#allocation2]  }
  0x39   : > { %p872_p0 = pnand %p870_p13, %p858_p2  ;;  %s874_s1 = sshll.u32 %s974_s6, 4  ;;  %s875_s1 = int_to_ptr.vmem [resolvable:$false] %s874_s1 }
  0x3a   : > { %s876_s11 = scalar_lea.vmem %s875_s1, 256  ;;  %p877_p10 = scmp.lt.s32.totalorder %s255_s17, %s875_s1 }
  0x3b   : > { %p873_p5 = pneg %p872_p0  ;;  %p878_p1 = scmp.lt.s32.totalorder %s876_s11, %s869_s8 }
  0x3d   : > { %p879_p4 = por %p878_p1, %p877_p10 }
  0x3f   : > { %p880_p6 = pnand %p879_p4, %p873_p5 }
  0x41   : > { %883 = shalt.err (!%p880_p6)
}
  0x42   : > { %726 = dma.hbm_to_vmem [thread:$0]  (!%p1119_p11), %s252_s15, 128, %s255_s17, %s244_s24  }
  0x43   : > { %263 = sbr.rel (%p1062_p8) target bundleno = 801 (0x321), region = 40  ;;  %s1130_s9 = sand.u32 (!%p1062_p8), 1, %s952_s19  }
  0x44   : > { %s647_s10 = sshll.u32 (!%p1062_p8), %s1130_s9, 3  ;;  %s266_s13 = scalar_lea.sflag (!%p1062_p8), [#allocation3], %s1130_s9 }
  0x45   : > { %s269_s1 = scalar_lea.vmem (!%p1062_p8), [#allocation2], %s647_s10  ;;  %p1211_p12 = scmp.ne.s32.totalorder (!%p1062_p8), %s1204_s28, 0 }
  0x48   : > { %935 = dma.done.wait (%p1211_p12), %s266_s13, 128  }
  0x49   : > { %937 = vsyncadd (%p1211_p12), %s266_s13, 4294967168  ;;  %p1212_p3 = scmp.ne.s32.totalorder %s1202_s26, 0 }
  0x4b   : > { %939 = dma.done.wait (%p1212_p3), [#allocation6], 1152  }
  0x4c   : > { %941 = vsyncadd (%p1212_p3), [#allocation6], 4294966144  ;;  %v975_v0 = vmov 0.0   ;;  %vm976_vm0 = vmmov 0   ;;  %v791_v1 = vld [vmem:[#allocation5] sm:$0xff]   ;;  %v317_v2 = vld [vmem:[%s269_s1] sm:$0xff] }
  0x4d   : > { %678 = vmatprep.subr.bf16.mxu0 %v975_v0  ;;  %680 = vmatprep.mubr.msk.bf16.mxu0 %vm976_vm0, %v975_v0  ;;  %v318_v3 = vpack.c.bf16 %v317_v2, %v317_v2  ;;  %vm334_vm1 = vcmask 130048   ;;  %v792_v4 = vld [vmem:[#allocation7 + $0x38] sm:$0xff]   ;;  %v793_v5 = vld [vmem:[#allocation7 + $0x30] sm:$0xff]   ;;  %v794_v6 = vld [vmem:[#allocation7 + $0x28] sm:$0xff]   ;;  %s664_s15 = sshll.u32 %s960_s21, 7  ;;  %s306_s16 = scalar_lea.vmem [#allocation8], %s647_s10 }
  0x4e   : > { %684 = vmatprep.subr.bf16.mxu1 %v975_v0  ;;  %700 = vmatprep.mubr.msk.bf16.mxu1 %vm976_vm0, %v975_v0  ;;  %v795_v7 = vld [vmem:[#allocation7 + $0x20] sm:$0xff]   ;;  %v796_v8 = vld [vmem:[#allocation7 + $0x18] sm:$0xff]   ;;  %v797_v9 = vld [vmem:[#allocation7 + $0x10] sm:$0xff]   ;;  %s524_s17 = sshll.u32 %s306_s16, 4  ;;  %s522_s8 = scalar_lea.hbm %s1197_s5, %s664_s15  ;;  %s525_s17 = int_to_ptr.vmem [resolvable:$true] %s524_s17 }
  0x4f   : > { %679 = vmatpush3.bf16.msra.mxu0 %v791_v1  ;;  %685 = vmatpush3.bf16.msra.mxu1 %v792_v4  ;;  %v798_v10 = vld [vmem:[#allocation7 + $0x8] sm:$0xff]   ;;  %v799_v11 = vld [vmem:[#allocation7] sm:$0xff]   ;;  %s511_s6 = scalar_lea.sflag [#allocation4], %s1130_s9  ;;  %s884_s11 = scalar_lea.vmem %s525_s17, 128 }
  0x50   : > { %686 = vmatprep.subr.bf16.mxu1 %v975_v0  ;;  %v651_v12 = vld [vmem:[%s1194_s2] ss:$0 sm:$0xff]  ;;  %p885_p8 = scmp.ne.s32.totalorder %s525_s17, %s884_s11  ;;  %s977_s13 = smov [#allocation8]  }
  0x51   : > { %v662_v21 = vld [vmem:[%s1196_s4] ss:$0 sm:$0xff]  ;;  %s888_s1 = sshll.u32 %s977_s13, 4  ;;  %s889_s1 = int_to_ptr.vmem [resolvable:$false] %s888_s1 }
  0x52   : > { %681 = vmatmul.mubr.msk.bf16.vlgmr.msra.gmra.mxu0 %vm334_vm1, %v318_v3  ;;  %p886_p9 = pnand %p885_p8, %p1103_p7  ;;  %s890_s21 = scalar_lea.vmem %s889_s1, 256 }
  0x53   : > { %687 = vmatpush3.bf16.msra.mxu1 %v793_v5  ;;  %p891_p2 = scmp.lt.s32.totalorder %s525_s17, %s889_s1  ;;  %p892_p13 = scmp.lt.s32.totalorder %s890_s21, %s884_s11 }
  0x54   : > { %688 = vmatprep.subr.bf16.mxu1 %v975_v0  ;;  %p887_p11 = pneg %p886_p9 }
  0x55   : > { %p893_p0 = por %p892_p13, %p891_p2 }
  0x57   : > { %689 = vmatpush3.bf16.msra.mxu1 %v794_v6  ;;  %p894_p5 = pnand %p893_p0, %p887_p11 }
  0x58   : > { %690 = vmatprep.subr.bf16.mxu1 %v975_v0 }
  0x5b   : > { %691 = vmatpush3.bf16.msra.mxu1 %v795_v7 }
  0x5c   : > { %692 = vmatprep.subr.bf16.mxu1 %v975_v0 }
  0x5f   : > { %693 = vmatpush3.bf16.msra.mxu1 %v796_v8 }
  0x60   : > { %694 = vmatprep.subr.bf16.mxu1 %v975_v0 }
  0x63   : > { %695 = vmatpush3.bf16.msra.mxu1 %v797_v9 }
  0x64   : > { %696 = vmatprep.subr.bf16.mxu1 %v975_v0 }
  0x67   : > { %697 = vmatpush3.bf16.msra.mxu1 %v798_v10 }
  0x68   : > { %698 = vmatprep.subr.bf16.mxu1 %v975_v0 }
  0x6b   : > { %699 = vmatpush3.bf16.msra.mxu1 %v799_v11 }
 0x112   : > { %v372_v13 = vpop.f32.mrf.mxu0 }
 0x113   : > { %v373_v14 = vadd.f32 %v651_v12, %v372_v13 }
 0x114   : > { %v682_v15 = vpop.f32.mrf.mxu0 }
 0x115   : > { %v378_v16 = vmax.f32 %v373_v14, 0.0 }
 0x116   : > { %v375_v17 = vpop.f32.mrf.mxu0 }
 0x117   : > { %v380_v18 = vpack.c.bf16 %v378_v16, %v378_v16 }
 0x118   : > { %v683_v19 = vpop.f32.mrf.mxu0 }
 0x119   : > { %701 = vmatmul.mubr.bf16.vlgmr.msra.gmra.mxu1 %v380_v18 }
 0x1d9   : > { %v479_v20 = vpop.f32.mrf.mxu1 }
 0x1da   : > { %v498_v23 = vadd.f32 %v662_v21, %v479_v20 }
 0x1db   : > { %v702_v22 = vpop.f32.mrf.mxu1 }
 0x1dc   : > { %499 = vmax.xlane.f32.xlu0 %v498_v23 }
 0x1dd   : > { %v482_v24 = vpop.f32.mrf.mxu1 }
 0x1df   : > { %v703_v25 = vpop.f32.mrf.mxu1 }
 0x265   : > { %v500_v26 = vpop.xlane.xlu0 %499 }
 0x266   : > { %v501_v27 = vsub.f32 %v498_v23, %v500_v26 }
 0x268   : > { %v502_v28 = vmul.f32 1.442695, %v501_v27 }
 0x26a   : > { %800 = vpow2.f32 %v502_v28 }
 0x277   : > { %v801_v29 = vpop.eup %800 }
 0x278   : > { %504 = vadd.xlane.f32.xlu0 %v801_v29 }
 0x301   : > { %v505_v30 = vpop.xlane.xlu0 %504 }
 0x302   : > { %802 = vlog2.f32 %v505_v30 }
 0x30f   : > { %v803_v31 = vpop.eup %802 }
 0x310   : > { %v507_v32 = vmul.f32 0.6931472, %v803_v31 }
 0x312   : > { %v508_v33 = vsub.f32 %v501_v27, %v507_v32 }
 0x314   : > { %509 = vst [vmem:[%s306_s16] sm:$0xff] %v508_v33 }
 0x315   : > { %897 = shalt.err (!%p894_p5)
}
 0x316   : > { %s898_s10 = scalar_lea.hbm %s522_s8, 128  ;;  %s902_s28 = scalar_lea.hbm %s1197_s5, 256 }
 0x317   : > { %p899_p10 = scmp.ne.s32.totalorder %s522_s8, %s898_s10  ;;  %p903_p6 = scmp.lt.s32.totalorder %s522_s8, %s1197_s5 }
 0x318   : > { %p904_p12 = scmp.lt.s32.totalorder %s902_s28, %s898_s10 }
 0x319   : > { %p900_p1 = pnand %p899_p10, %p1103_p7 }
 0x31a   : > { %p905_p3 = por %p904_p12, %p903_p6 }
 0x31b   : > { %p901_p4 = pneg %p900_p1 }
 0x31d   : > { %p906_p8 = pnand %p905_p3, %p901_p4 }
 0x31f   : > { %909 = shalt.err (!%p906_p8)
}
 0x320   : > { %714 = dma.vmem_to_hbm [thread:$0]  (%p1103_p7), %s525_s17, 128, %s522_s8, %s511_s6  }
 0x321 PF: > { %s536_s15 = sand.u32 1, %s948_s18   ;;  %p1213_p9 = scmp.ne.s32.totalorder %s1205_s29, 0 }
 0x322   : > { %p1214_p11 = scmp.ge.s32.totalorder %s968_s23, 2  ;;  %s537_s16 = scalar_lea.sflag [#allocation4], %s536_s15 }
 0x324   : > { %p728_p2 = pnand %p1214_p11, %p1213_p9 }
 0x326   : > { %p729_p13 = pneg %p728_p2 }
 0x328   : > { %943 = dma.done.wait (%p729_p13), %s537_s16, 128  }
 0x329   : > { %945 = vsyncadd (%p729_p13), %s537_s16, 4294967168  ;;  %s22_s23 = sadd.s32 1, %s968_s23   ;;  %s1215_s18 = smov %s952_s19 }
 0x32a   : > { %p19_p0 = scmp.ge.s32.totalorder %s22_s23, 4   ;;  %s1216_s19 = smov %s956_s20 }
 0x32b   : > { %s1217_s20 = smov %s1112_s12  ;;  %s1218_s21 = smov %s964_s22 }
 0x32c   : > { %s1219_s22 = smov %s1221_s25  ;;  %21 = sbr.rel (!%p19_p0) target bundleno = 9 (0x9), region = 106 }
 0x331   :  { %542 = vsyncpa [#allocation3], 1 }
 0x332   :  { %544 = vsyncpa [#allocation3 + $0x1], 1 }
 0x333   :  { %545 = vsyncpa [#allocation6], 1 }
 0x334   :  { %546 = vsyncpa [#allocation4], 1 }
 0x335   :  { %548 = vsyncpa [#allocation4 + $0x1], 1 }

// kernel: tpu_custom_call.1
= control target key start
LH: loop header
LB: loop body
LE: loop exit
PB: predicated region body
PF: predicated region fallthrough
CT: control target
= control target key end

     0   :  { %s1192_s0 = inlined_call_operand.hbm [shape: f32[16,16], index: 0, kind: input, shape index: {}]   ;;  %s1193_s1 = inlined_call_operand.hbm [shape: bf16[16,128], index: 1, kind: input, shape index: {}]   ;;  %s1194_s2 = inlined_call_operand.vmem [shape: f32[1,128], index: 2, kind: input, shape index: {}]   ;;  %s1195_s3 = inlined_call_operand.hbm [shape: bf16[128,128], index: 3, kind: input, shape index: {}]   ;;  %s1196_s4 = inlined_call_operand.vmem [shape: f32[1,128], index: 4, kind: input, shape index: {}]   ;;  %s1197_s5 = inlined_call_operand.hbm [shape: f32[16,128], index: 5, kind: output, shape index: {}]  }
   0x1   :  { %1201 = sst [smem:[#allocation12_spill]] %s1193_s1 }
   0x2   :  { %10 = vsyncpa [#allocation3], 0 }
   0x3   :  { %12 = vsyncpa [#allocation3 + $0x1], 0 }
   0x4   :  { %13 = vsyncpa [#allocation6], 0 }
   0x5   :  { %14 = vsyncpa [#allocation4], 0 }
   0x6   :  { %16 = vsyncpa [#allocation4 + $0x1], 0  ;;  %s1008_s18 = smov 0   ;;  %s1010_s19 = smov 0  }
   0x7   :  { %s1012_s20 = smov 0   ;;  %s1014_s21 = smov 0  }
   0x8   :  { %s1016_s22 = smov 0   ;;  %s1018_s23 = smov 0  }
   0x9 LB: > { %s637_s24 = sadd.s32 4294967295, %s968_s23   ;;  %s638_s25 = sadd.s32 4294967294, %s968_s23   ;;  %s968_s23 = sphi %s1018_s23, %s22_s23   ;;  %s964_s22 = sphi %s1016_s22, %s1219_s22   ;;  %s960_s21 = sphi %s1014_s21, %s1218_s21   ;;  %s956_s20 = sphi %s1012_s20, %s1217_s20   ;;  %s952_s19 = sphi %s1010_s19, %s1216_s19   ;;  %s948_s18 = sphi %s1008_s18, %s1215_s18  }
   0xa   : > { %p54_p0 = scmp.ne.s32.totalorder %s952_s19, %s948_s18  ;;  %p1042_p1 = scmp.eq.s32.totalorder %s637_s24, 0 }
   0xb   : > { %p1046_p2 = scmp.eq.s32.totalorder %s637_s24, 1  ;;  %p183_p3 = scmp.eq.s32.totalorder %s638_s25, 1 }
   0xc   : > { %s1202_s26 = scalar_select %p1042_p1, 1, 0 }
   0xd   : > { %p1052_p4 = por %p1042_p1, %p54_p0  ;;  %p639_p5 = scmp.ge.s32.totalorder %s968_s23, 1 }
   0xe   : > { %p1057_p6 = por %p183_p3, %p54_p0  ;;  %p190_p7 = scmp.lt.s32.totalorder %s968_s23, 3 }
   0xf   : > { %s1204_s28 = scalar_select %p1052_p4, 1, 0 }
  0x10   : > { %s1205_s29 = scalar_select %p1057_p6, 1, 0 }
  0x11   : > { %p1062_p8 = pnand %p639_p5, %p190_p7  ;;  %s970_s6 = smov [#allocation5]  }
  0x12   : > { %s204_s7 = sshll.u32 %s970_s6, 4  ;;  %s971_s9 = smov [#allocation7]   ;;  %s205_s7 = int_to_ptr.vmem [resolvable:$true] %s204_s7 }
  0x13   : > { %p716_p9 = pneg %p1062_p8  ;;  %s226_s10 = sshll.u32 %s971_s9, 4  ;;  %s227_s10 = int_to_ptr.vmem [resolvable:$true] %s226_s10 }
  0x14   : > { %s815_s11 = scalar_lea.vmem %s205_s7, 128  ;;  %p823_p5 = scmp.lt.s32.totalorder %s205_s7, %s205_s7 }
  0x15   : > { %p1071_p11 = pnand %p716_p9, %p1042_p1  ;;  %p816_p13 = scmp.ne.s32.totalorder %s205_s7, %s815_s11 }
  0x16   : > { %p824_p7 = scmp.lt.s32.totalorder %s815_s11, %s815_s11 }
  0x17   : > { %p806_p12 = pneg %p1071_p11 }
  0x18   : > { %p825_p10 = por %p824_p7, %p823_p5 }
  0x19   : > { %p818_p0 = pnand %p816_p13, %p806_p12 }
  0x1b   : > { %p819_p3 = pneg %p818_p0 }
  0x1d   : > { %p826_p9 = pnand %p825_p10, %p819_p3 }
  0x1f   : > { %829 = shalt.err (!%p826_p9)
}
  0x20   : > { %s972_s12 = smov 64   ;;  %s973_s13 = smov 4  }
  0x21   : > { %s1208_s1 = sld [smem:[#allocation12_spill]]  ;;  %s841_s16 = scalar_lea.vmem %s227_s10, 1024 }
  0x22   : > { %p842_p6 = scmp.ne.s32.totalorder %s227_s10, %s841_s16  ;;  %p849_p1 = scmp.lt.s32.totalorder %s227_s10, %s227_s10 }
  0x23   : > { %p850_p4 = scmp.lt.s32.totalorder %s841_s16, %s841_s16 }
  0x24   : > { %p844_p13 = pnand %p842_p6, %p806_p12 }
  0x25   : > { %p851_p5 = por %p850_p4, %p849_p1 }
  0x26   : > { %p845_p0 = pneg %p844_p13 }
  0x27   : > { %719 = dma.hbm_to_vmem [thread:$0]  (!%p1071_p11), %s1208_s1, 128, %s205_s7, [#allocation6], %s972_s12, %s972_s12, %s973_s13  }
  0x28   : > { %p852_p10 = pnand %p851_p5, %p845_p0 }
  0x2a   : > { %855 = shalt.err (!%p852_p10)
}
  0x2b   : > { %722 = dma.hbm_to_vmem [thread:$0]  (!%p1071_p11), %s1195_s3, 1024, %s227_s10, [#allocation6], %s972_s12, %s972_s12, %s973_s13  }
  0x2c   : > { %s34_s25 = sadd.s32 1, %s964_s22  ;;  %s41_s6 = sadd.s32 1, %s956_s20 }
  0x2d   : > { %p36_p1 = scmp.ge.s32.totalorder %s34_s25, 2  ;;  %p48_p4 = scmp.ne.s32.totalorder %s956_s20, %s952_s19 }
  0x2e   : > { %p49_p6 = scmp.eq.s32.totalorder %s968_s23, 0  ;;  %p733_p12 = scmp.lt.s32.totalorder %s968_s23, 2 }
  0x2f   : > { %s1221_s25 = smov (%p36_p1, %s34_s25), 0  ;;  %p1103_p7 = por %p1046_p2, %p48_p4 }
  0x30   : > { %p50_p3 = por %p49_p6, %p48_p4  ;;  %s38_s8 = ssub.s32 %s964_s22, %s1221_s25 }
  0x31   : > { %s243_s9 = sand.u32 1, %s956_s20   ;;  %p39_p9 = scmp.eq.s32.totalorder %s38_s8, 0 }
  0x32   : > { %s644_s10 = sshll.u32 %s243_s9, 3  ;;  %s645_s11 = sshll.u32 %s964_s22, 7 }
  0x33   : > { %s1112_s12 = scalar_select %p39_p9, %s956_s20, %s41_s6  }
  0x34   : > { %s252_s15 = scalar_lea.hbm %s1192_s0, %s645_s11  ;;  %s247_s16 = scalar_lea.vmem [#allocation2], %s644_s10 }
  0x35   : > { %s254_s17 = sshll.u32 %s247_s16, 4  ;;  %p1119_p11 = pnand %p733_p12, %p50_p3  ;;  %s255_s17 = int_to_ptr.vmem [resolvable:$true] %s254_s17 }
  0x36   : > { %s244_s24 = scalar_lea.sflag [#allocation3], %s243_s9  ;;  %s869_s8 = scalar_lea.vmem %s255_s17, 128 }
  0x37   : > { %p858_p2 = pneg %p1119_p11  ;;  %p870_p13 = scmp.ne.s32.totalorder %s255_s17, %s869_s8 }
  0x38   : > { %s974_s6 = smov [#allocation2]  }
  0x39   : > { %p872_p0 = pnand %p870_p13, %p858_p2  ;;  %s874_s1 = sshll.u32 %s974_s6, 4  ;;  %s875_s1 = int_to_ptr.vmem [resolvable:$false] %s874_s1 }
  0x3a   : > { %s876_s11 = scalar_lea.vmem %s875_s1, 256  ;;  %p877_p10 = scmp.lt.s32.totalorder %s255_s17, %s875_s1 }
  0x3b   : > { %p873_p5 = pneg %p872_p0  ;;  %p878_p1 = scmp.lt.s32.totalorder %s876_s11, %s869_s8 }
  0x3d   : > { %p879_p4 = por %p878_p1, %p877_p10 }
  0x3f   : > { %p880_p6 = pnand %p879_p4, %p873_p5 }
  0x41   : > { %883 = shalt.err (!%p880_p6)
}
  0x42   : > { %726 = dma.hbm_to_vmem [thread:$0]  (!%p1119_p11), %s252_s15, 128, %s255_s17, %s244_s24  }
  0x43   : > { %263 = sbr.rel (%p1062_p8) target bundleno = 801 (0x321), region = 40  ;;  %s1130_s9 = sand.u32 (!%p1062_p8), 1, %s952_s19  }
  0x44   : > { %s647_s10 = sshll.u32 (!%p1062_p8), %s1130_s9, 3  ;;  %s266_s13 = scalar_lea.sflag (!%p1062_p8), [#allocation3], %s1130_s9 }
  0x45   : > { %s269_s1 = scalar_lea.vmem (!%p1062_p8), [#allocation2], %s647_s10  ;;  %p1211_p12 = scmp.ne.s32.totalorder (!%p1062_p8), %s1204_s28, 0 }
  0x48   : > { %935 = dma.done.wait (%p1211_p12), %s266_s13, 128  }
  0x49   : > { %937 = vsyncadd (%p1211_p12), %s266_s13, 4294967168  ;;  %p1212_p3 = scmp.ne.s32.totalorder %s1202_s26, 0 }
  0x4b   : > { %939 = dma.done.wait (%p1212_p3), [#allocation6], 1152  }
  0x4c   : > { %941 = vsyncadd (%p1212_p3), [#allocation6], 4294966144  ;;  %v975_v0 = vmov 0.0   ;;  %vm976_vm0 = vmmov 0   ;;  %v791_v1 = vld [vmem:[#allocation5] sm:$0xff]   ;;  %v317_v2 = vld [vmem:[%s269_s1] sm:$0xff] }
  0x4d   : > { %678 = vmatprep.subr.bf16.mxu0 %v975_v0  ;;  %680 = vmatprep.mubr.msk.bf16.mxu0 %vm976_vm0, %v975_v0  ;;  %v318_v3 = vpack.c.bf16 %v317_v2, %v317_v2  ;;  %vm334_vm1 = vcmask 130048   ;;  %v792_v4 = vld [vmem:[#allocation7 + $0x38] sm:$0xff]   ;;  %v793_v5 = vld [vmem:[#allocation7 + $0x30] sm:$0xff]   ;;  %v794_v6 = vld [vmem:[#allocation7 + $0x28] sm:$0xff]   ;;  %s664_s15 = sshll.u32 %s960_s21, 7  ;;  %s306_s16 = scalar_lea.vmem [#allocation8], %s647_s10 }
  0x4e   : > { %684 = vmatprep.subr.bf16.mxu1 %v975_v0  ;;  %700 = vmatprep.mubr.msk.bf16.mxu1 %vm976_vm0, %v975_v0  ;;  %v795_v7 = vld [vmem:[#allocation7 + $0x20] sm:$0xff]   ;;  %v796_v8 = vld [vmem:[#allocation7 + $0x18] sm:$0xff]   ;;  %v797_v9 = vld [vmem:[#allocation7 + $0x10] sm:$0xff]   ;;  %s524_s17 = sshll.u32 %s306_s16, 4  ;;  %s522_s8 = scalar_lea.hbm %s1197_s5, %s664_s15  ;;  %s525_s17 = int_to_ptr.vmem [resolvable:$true] %s524_s17 }
  0x4f   : > { %679 = vmatpush3.bf16.msra.mxu0 %v791_v1  ;;  %685 = vmatpush3.bf16.msra.mxu1 %v792_v4  ;;  %v798_v10 = vld [vmem:[#allocation7 + $0x8] sm:$0xff]   ;;  %v799_v11 = vld [vmem:[#allocation7] sm:$0xff]   ;;  %s511_s6 = scalar_lea.sflag [#allocation4], %s1130_s9  ;;  %s884_s11 = scalar_lea.vmem %s525_s17, 128 }
  0x50   : > { %686 = vmatprep.subr.bf16.mxu1 %v975_v0  ;;  %v651_v12 = vld [vmem:[%s1194_s2] ss:$0 sm:$0xff]  ;;  %p885_p8 = scmp.ne.s32.totalorder %s525_s17, %s884_s11  ;;  %s977_s13 = smov [#allocation8]  }
  0x51   : > { %v662_v21 = vld [vmem:[%s1196_s4] ss:$0 sm:$0xff]  ;;  %s888_s1 = sshll.u32 %s977_s13, 4  ;;  %s889_s1 = int_to_ptr.vmem [resolvable:$false] %s888_s1 }
  0x52   : > { %681 = vmatmul.mubr.msk.bf16.vlgmr.msra.gmra.mxu0 %vm334_vm1, %v318_v3  ;;  %p886_p9 = pnand %p885_p8, %p1103_p7  ;;  %s890_s21 = scalar_lea.vmem %s889_s1, 256 }
  0x53   : > { %687 = vmatpush3.bf16.msra.mxu1 %v793_v5  ;;  %p891_p2 = scmp.lt.s32.totalorder %s525_s17, %s889_s1  ;;  %p892_p13 = scmp.lt.s32.totalorder %s890_s21, %s884_s11 }
  0x54   : > { %688 = vmatprep.subr.bf16.mxu1 %v975_v0  ;;  %p887_p11 = pneg %p886_p9 }
  0x55   : > { %p893_p0 = por %p892_p13, %p891_p2 }
  0x57   : > { %689 = vmatpush3.bf16.msra.mxu1 %v794_v6  ;;  %p894_p5 = pnand %p893_p0, %p887_p11 }
  0x58   : > { %690 = vmatprep.subr.bf16.mxu1 %v975_v0 }
  0x5b   : > { %691 = vmatpush3.bf16.msra.mxu1 %v795_v7 }
  0x5c   : > { %692 = vmatprep.subr.bf16.mxu1 %v975_v0 }
  0x5f   : > { %693 = vmatpush3.bf16.msra.mxu1 %v796_v8 }
  0x60   : > { %694 = vmatprep.subr.bf16.mxu1 %v975_v0 }
  0x63   : > { %695 = vmatpush3.bf16.msra.mxu1 %v797_v9 }
  0x64   : > { %696 = vmatprep.subr.bf16.mxu1 %v975_v0 }
  0x67   : > { %697 = vmatpush3.bf16.msra.mxu1 %v798_v10 }
  0x68   : > { %698 = vmatprep.subr.bf16.mxu1 %v975_v0 }
  0x6b   : > { %699 = vmatpush3.bf16.msra.mxu1 %v799_v11 }
 0x112   : > { %v372_v13 = vpop.f32.mrf.mxu0 }
 0x113   : > { %v373_v14 = vadd.f32 %v651_v12, %v372_v13 }
 0x114   : > { %v682_v15 = vpop.f32.mrf.mxu0 }
 0x115   : > { %v378_v16 = vmax.f32 %v373_v14, 0.0 }
 0x116   : > { %v375_v17 = vpop.f32.mrf.mxu0 }
 0x117   : > { %v380_v18 = vpack.c.bf16 %v378_v16, %v378_v16 }
 0x118   : > { %v683_v19 = vpop.f32.mrf.mxu0 }
 0x119   : > { %701 = vmatmul.mubr.bf16.vlgmr.msra.gmra.mxu1 %v380_v18 }
 0x1d9   : > { %v479_v20 = vpop.f32.mrf.mxu1 }
 0x1da   : > { %v498_v23 = vadd.f32 %v662_v21, %v479_v20 }
 0x1db   : > { %v702_v22 = vpop.f32.mrf.mxu1 }
 0x1dc   : > { %499 = vmax.xlane.f32.xlu0 %v498_v23 }
 0x1dd   : > { %v482_v24 = vpop.f32.mrf.mxu1 }
 0x1df   : > { %v703_v25 = vpop.f32.mrf.mxu1 }
 0x265   : > { %v500_v26 = vpop.xlane.xlu0 %499 }
 0x266   : > { %v501_v27 = vsub.f32 %v498_v23, %v500_v26 }
 0x268   : > { %v502_v28 = vmul.f32 1.442695, %v501_v27 }
 0x26a   : > { %800 = vpow2.f32 %v502_v28 }
 0x277   : > { %v801_v29 = vpop.eup %800 }
 0x278   : > { %504 = vadd.xlane.f32.xlu0 %v801_v29 }
 0x301   : > { %v505_v30 = vpop.xlane.xlu0 %504 }
 0x302   : > { %802 = vlog2.f32 %v505_v30 }
 0x30f   : > { %v803_v31 = vpop.eup %802 }
 0x310   : > { %v507_v32 = vmul.f32 0.6931472, %v803_v31 }
 0x312   : > { %v508_v33 = vsub.f32 %v501_v27, %v507_v32 }
 0x314   : > { %509 = vst [vmem:[%s306_s16] sm:$0xff] %v508_v33 }
 0x315   : > { %897 = shalt.err (!%p894_p5)
}
 0x316   : > { %s898_s10 = scalar_lea.hbm %s522_s8, 128  ;;  %s902_s28 = scalar_lea.hbm %s1197_s5, 256 }
 0x317   : > { %p899_p10 = scmp.ne.s32.totalorder %s522_s8, %s898_s10  ;;  %p903_p6 = scmp.lt.s32.totalorder %s522_s8, %s1197_s5 }
 0x318   : > { %p904_p12 = scmp.lt.s32.totalorder %s902_s28, %s898_s10 }
 0x319   : > { %p900_p1 = pnand %p899_p10, %p1103_p7 }
 0x31a   : > { %p905_p3 = por %p904_p12, %p903_p6 }
 0x31b   : > { %p901_p4 = pneg %p900_p1 }
 0x31d   : > { %p906_p8 = pnand %p905_p3, %p901_p4 }
 0x31f   : > { %909 = shalt.err (!%p906_p8)
}
 0x320   : > { %714 = dma.vmem_to_hbm [thread:$0]  (%p1103_p7), %s525_s17, 128, %s522_s8, %s511_s6  }
 0x321 PF: > { %s536_s15 = sand.u32 1, %s948_s18   ;;  %p1213_p9 = scmp.ne.s32.totalorder %s1205_s29, 0 }
 0x322   : > { %p1214_p11 = scmp.ge.s32.totalorder %s968_s23, 2  ;;  %s537_s16 = scalar_lea.sflag [#allocation4], %s536_s15 }
 0x324   : > { %p728_p2 = pnand %p1214_p11, %p1213_p9 }
 0x326   : > { %p729_p13 = pneg %p728_p2 }
 0x328   : > { %943 = dma.done.wait (%p729_p13), %s537_s16, 128  }
 0x329   : > { %945 = vsyncadd (%p729_p13), %s537_s16, 4294967168  ;;  %s22_s23 = sadd.s32 1, %s968_s23   ;;  %s1215_s18 = smov %s952_s19 }
 0x32a   : > { %p19_p0 = scmp.ge.s32.totalorder %s22_s23, 4   ;;  %s1216_s19 = smov %s956_s20 }
 0x32b   : > { %s1217_s20 = smov %s1112_s12  ;;  %s1218_s21 = smov %s964_s22 }
 0x32c   : > { %s1219_s22 = smov %s1221_s25  ;;  %21 = sbr.rel (!%p19_p0) target bundleno = 9 (0x9), region = 106 }
 0x331   :  { %542 = vsyncpa [#allocation3], 1 }
 0x332   :  { %544 = vsyncpa [#allocation3 + $0x1], 1 }
 0x333   :  { %545 = vsyncpa [#allocation6], 1 }
 0x334   :  { %546 = vsyncpa [#allocation4], 1 }
 0x335   :  { %548 = vsyncpa [#allocation4 + $0x1], 1 }

</bundles_post_ra>
